<compile_context>
chip_gen: v5e
topology: v5e:2x2
jax: 0.10.0
libtpu: 0.0.40
codegen_flags: <defaults>
</compile_context>

<pallas_src>
import jax
import jax.numpy as jnp
from jax.experimental import pallas as pl
from jax.experimental.pallas import tpu as pltpu


def _add_kernel(a_ref, b_ref, o_ref):
    o_ref[...] = a_ref[...] + b_ref[...]


def _cdiv(a, b):
    return -(-a // b)


def _divisors(q):
    ds = []
    i = 1
    while i * i <= q:
        if q % i == 0:
            ds.append(i)
            if i != q // i:
                ds.append(q // i)
        i += 1
    return sorted(ds)


def _default_target_block_bytes():
    # Generation-aware: v5e (~0.8 TB/s) already amortizes the ~0.35us/step
    # overhead at 2 MiB blocks; v6e/v7x (1.4 / 3.2 TB/s) want ~4 MiB blocks.
    try:
        kind = jax.devices()[0].device_kind.lower()
    except Exception:
        return 2 << 20
    if "v5" in kind or "v4" in kind:
        return 2 << 20
    return 4 << 20


def residual_add(x114, x100, *, target_block_bytes=None,
                 min_pipeline_bytes=192 << 10):
    """x115 = x114 + x100 (elementwise, exact)."""
    assert x114.shape == x100.shape and x114.dtype == x100.dtype
    orig_shape = x114.shape
    n = x114.size
    itemsize = jnp.dtype(x114.dtype).itemsize
    total_bytes = n * itemsize

    if target_block_bytes is None:
        target_block_bytes = _default_target_block_bytes()
    block_cap_bytes = min(2 * target_block_bytes, 8 << 20)

    # ---- how many grid steps do we want? -----------------------------------
    if total_bytes <= min_pipeline_bytes:
        g_target = 1                      # truly tiny: one DMA each way
    else:
        # >=4 steps: loads/stores pipeline and v7x's two TCs each get >=2
        # steps; scale up so each block stays ~target_block_bytes.
        g_target = max(4, _cdiv(total_bytes, target_block_bytes))
        if g_target % 2:
            g_target += 1                 # even -> both v7x cores get work

    # ---- lane-dense, contiguous (g, m, 128) layout --------------------------
    # Every block is (1, m, 128): one contiguous HBM chunk per DMA (no strided
    # column tiling), last two dims are full array dims so the (8,128)
    # BlockSpec rule always holds, and last dim == 128 -> unmasked vst stores.
    pad = 0
    g = None
    if n % 128 == 0:
        q = n // 128
        g_min = max(1, _cdiv(total_bytes, block_cap_bytes))
        cands = [d for d in _divisors(q)
                 if d >= g_min and (g_target == 1 or d >= 2)]
        if cands:
            g = min(cands, key=lambda d: (abs(d - g_target), d))
            m = q // g
            # reject pathological over-fragmentation (e.g. q prime -> 1-row blocks)
            if g > 4 * g_target and m * 128 * itemsize < (64 << 10):
                g = None

    if g is None:
        # Fallback: pad the flat array up to g_target * m * 128 elements so the
        # layout stays lane-dense & contiguous (pad traffic << streamed bytes),
        # instead of masked sub-128-lane stores.
        g = g_target
        m = _cdiv(_cdiv(n, 128), g)
        pad = g * m * 128 - n

    block_bytes = m * 128 * itemsize
    # 3 operands x 2 pipeline buffers x block + margin; sized to actual need so
    # we do not hog scoped VMEM (matters most on v7x's 64 MiB).
    vmem_limit = int(min(max(6 * block_bytes + (2 << 20), 4 << 20), 56 << 20))

    a = x114.reshape(-1)
    b = x100.reshape(-1)
    if pad:
        a = jnp.pad(a, (0, pad))
        b = jnp.pad(b, (0, pad))
    a = a.reshape(g, m, 128)
    b = b.reshape(g, m, 128)

    out = pl.pallas_call(
        _add_kernel,
        out_shape=jax.ShapeDtypeStruct((g, m, 128), x114.dtype),
        grid_spec=pltpu.PrefetchScalarGridSpec(
            num_scalar_prefetch=0,
            grid=(g,),
            in_specs=[
                pl.BlockSpec((1, m, 128), lambda i: (i, 0, 0)),
                pl.BlockSpec((1, m, 128), lambda i: (i, 0, 0)),
            ],
            out_specs=pl.BlockSpec((1, m, 128), lambda i: (i, 0, 0)),
        ),
        compiler_params=pltpu.CompilerParams(
            dimension_semantics=("parallel",),
            vmem_limit_bytes=vmem_limit,
        ),
        cost_estimate=pl.CostEstimate(
            flops=n,
            transcendentals=0,
            bytes_accessed=3 * n * itemsize,
        ),
        # TODO(synk): if x114 is dead after this add in the surrounding graph,
        # pass input_output_aliases={0: 0} to write the result in place.
    )(a, b)

    out = out.reshape(-1)
    if pad:
        out = out[:n]
    return out.reshape(orig_shape)


if __name__ == "__main__":
    key = jax.random.PRNGKey(0)
    k1, k2 = jax.random.split(key)
    # Exact activation shape from the PyTorch module (NCHW), already small (~0.5 MB).
    shape = (1, 40, 56, 56)
    x114 = jax.random.normal(k1, shape, dtype=jnp.float32)
    x100 = jax.random.normal(k2, shape, dtype=jnp.float32)

    out = residual_add(x114, x100)
    jax.block_until_ready(out)

    ref = x114 + x100
    assert out.shape == shape
    assert out.dtype == x114.dtype
    assert jnp.allclose(out, ref, atol=1e-6, rtol=1e-6)
    print("KERNEL_OK")
</pallas_src>

<mosaic_0001>
module attributes {stable_mosaic.version = 11 : i64} {
  func.func @_add_kernel(%arg0: i32, %arg1: memref<1x245x128xf32, #tpu.memory_space<vmem>>, %arg2: memref<1x245x128xf32, #tpu.memory_space<vmem>>, %arg3: memref<1x245x128xf32, #tpu.memory_space<vmem>>) attributes {dimension_semantics = [#tpu.dimension_semantics<parallel>], iteration_bounds = array<i64: 4>, scalar_prefetch = 0 : i64, scratch_operands = 0 : i64, tpu.core_type = #tpu.core_type<tc>, window_params = [{transform_indices = @transform_0, window_bounds = array<i64: 1, 245, 128>}, {transform_indices = @transform_1, window_bounds = array<i64: 1, 245, 128>}, {transform_indices = @transform_2, window_bounds = array<i64: 1, 245, 128>}]} {
    %c0 = arith.constant 0 : index
    %c0_0 = arith.constant 0 : index
    %c0_1 = arith.constant 0 : index
    %0 = vector.load %arg1[%c0, %c0_0, %c0_1] : memref<1x245x128xf32, #tpu.memory_space<vmem>>, vector<1x245x128xf32>
    %c0_2 = arith.constant 0 : index
    %c0_3 = arith.constant 0 : index
    %c0_4 = arith.constant 0 : index
    %1 = vector.load %arg2[%c0_2, %c0_3, %c0_4] : memref<1x245x128xf32, #tpu.memory_space<vmem>>, vector<1x245x128xf32>
    %2 = arith.addf %0, %1 : vector<1x245x128xf32>
    %c0_5 = arith.constant 0 : index
    %c0_6 = arith.constant 0 : index
    %c0_7 = arith.constant 0 : index
    %3 = vector.load %arg3[%c0_5, %c0_6, %c0_7] : memref<1x245x128xf32, #tpu.memory_space<vmem>>, vector<1x245x128xf32>
    tpu.vector_store %arg3[%c0_5, %c0_6, %c0_7], %2 {strides = array<i32>} : memref<1x245x128xf32, #tpu.memory_space<vmem>>, vector<1x245x128xf32>,
    return
  }
  func.func @transform_0(%arg0: i32) -> (i32, i32, i32) {
    %c0_i32 = arith.constant 0 : i32
    %c0_i32_0 = arith.constant 0 : i32
    %c0_i32_1 = arith.constant 0 : i32
    return %arg0, %c0_i32, %c0_i32_0 : i32, i32, i32
  }
  func.func @transform_1(%arg0: i32) -> (i32, i32, i32) {
    %c0_i32 = arith.constant 0 : i32
    %c0_i32_0 = arith.constant 0 : i32
    %c0_i32_1 = arith.constant 0 : i32
    return %arg0, %c0_i32, %c0_i32_0 : i32, i32, i32
  }
  func.func @transform_2(%arg0: i32) -> (i32, i32, i32) {
    %c0_i32 = arith.constant 0 : i32
    %c0_i32_0 = arith.constant 0 : i32
    %c0_i32_1 = arith.constant 0 : i32
    return %arg0, %c0_i32, %c0_i32_0 : i32, i32, i32
  }
}

</mosaic_0001>

<bundles_post_ra>
// kernel: tpu_custom_call.1
= control target key start
LH: loop header
LB: loop body
LE: loop exit
PB: predicated region body
PF: predicated region fallthrough
CT: control target
= control target key end

     0   :  { %s397_s9 = smov 0   ;;  %s516_s0 = inlined_call_operand.vmem [shape: f32[4,245,128], index: 0, kind: input, shape index: {}]   ;;  %s517_s1 = inlined_call_operand.vmem [shape: f32[4,245,128], index: 1, kind: input, shape index: {}]   ;;  %s518_s2 = inlined_call_operand.vmem [shape: f32[4,245,128], index: 2, kind: output, shape index: {}]  }
   0x1 LB: > { %s355_s10 = sadd.s32 4294967295, %s380_s9   ;;  %p359_p0 = scmp.ge.s32.totalorder %s380_s9, 1  ;;  %s380_s9 = sphi %s397_s9, %s12_s9  }
   0x2   : > { %p122_p1 = scmp.lt.s32.totalorder %s380_s9, 5 }
   0x4   : > { %p123_p2 = pnand %p359_p0, %p122_p1 }
   0x5   : > { %p149_p3 = scmp.lt.s32.totalorder (!%p123_p2), %s355_s10, 3 }
   0x6   : > { %126 = sbr.rel (%p123_p2) target bundleno = 50 (0x32), region = 28 }
   0xb   : > { %s520_s10 = smov (!%p149_p3, %s355_s10), 3 }
   0xc   : > { %s365_s11 = smul.u32 248, %s520_s10 }
   0xe   : > { %s408_s14 = scalar_lea.vmem %s516_s0, %s365_s11  ;;  %s413_s17 = scalar_lea.vmem %s517_s1, %s365_s11 }
   0xf   : > { %s418_s20 = scalar_lea.vmem %s518_s2, %s365_s11  ;;  %v164_v0 = vld [vmem:[%s408_s14] sm:$0xff]  ;;  %v165_v2 = vld [vmem:[%s408_s14 + $0x8] sm:$0xff]  ;;  %v166_v5 = vld [vmem:[%s408_s14 + $0x10] sm:$0xff] }
  0x10   : > { %v195_v1 = vld [vmem:[%s413_s17] sm:$0xff]  ;;  %v196_v4 = vld [vmem:[%s413_s17 + $0x8] sm:$0xff]  ;;  %v197_v6 = vld [vmem:[%s413_s17 + $0x10] sm:$0xff] }
  0x11   : > { %v226_v3 = vadd.f32 %v195_v1, %v164_v0  ;;  %v227_v7 = vadd.f32 %v196_v4, %v165_v2  ;;  %v228_v8 = vadd.f32 %v197_v6, %v166_v5  ;;  %v167_v9 = vld [vmem:[%s408_s14 + $0x18] sm:$0xff]  ;;  %v168_v11 = vld [vmem:[%s408_s14 + $0x20] sm:$0xff]  ;;  %v169_v14 = vld [vmem:[%s408_s14 + $0x28] sm:$0xff] }
  0x12   : > { %v198_v10 = vld [vmem:[%s413_s17 + $0x18] sm:$0xff]  ;;  %v199_v13 = vld [vmem:[%s413_s17 + $0x20] sm:$0xff]  ;;  %v200_v15 = vld [vmem:[%s413_s17 + $0x28] sm:$0xff] }
  0x13   : > { %257 = vst [vmem:[%s418_s20] sm:$0xff] %v226_v3  ;;  %v229_v12 = vadd.f32 %v198_v10, %v167_v9  ;;  %v230_v16 = vadd.f32 %v199_v13, %v168_v11  ;;  %v231_v17 = vadd.f32 %v200_v15, %v169_v14  ;;  %v170_v18 = vld [vmem:[%s408_s14 + $0x30] sm:$0xff]  ;;  %v171_v20 = vld [vmem:[%s408_s14 + $0x38] sm:$0xff]  ;;  %v172_v23 = vld [vmem:[%s408_s14 + $0x40] sm:$0xff] }
  0x14   : > { %258 = vst [vmem:[%s418_s20 + $0x8] sm:$0xff] %v227_v7  ;;  %v201_v19 = vld [vmem:[%s413_s17 + $0x30] sm:$0xff]  ;;  %v202_v22 = vld [vmem:[%s413_s17 + $0x38] sm:$0xff]  ;;  %v203_v24 = vld [vmem:[%s413_s17 + $0x40] sm:$0xff] }
  0x15   : > { %259 = vst [vmem:[%s418_s20 + $0x10] sm:$0xff] %v228_v8  ;;  %v232_v21 = vadd.f32 %v201_v19, %v170_v18  ;;  %v233_v25 = vadd.f32 %v202_v22, %v171_v20  ;;  %v173_v26 = vld [vmem:[%s408_s14 + $0x48] sm:$0xff]  ;;  %v174_v28 = vld [vmem:[%s408_s14 + $0x50] sm:$0xff]  ;;  %v234_v29 = vadd.f32 %v203_v24, %v172_v23  ;;  %v175_v31 = vld [vmem:[%s408_s14 + $0x58] sm:$0xff] }
  0x16   : > { %260 = vst [vmem:[%s418_s20 + $0x18] sm:$0xff] %v229_v12  ;;  %v204_v27 = vld [vmem:[%s413_s17 + $0x48] sm:$0xff]  ;;  %v205_v30 = vld [vmem:[%s413_s17 + $0x50] sm:$0xff]  ;;  %v206_v32 = vld [vmem:[%s413_s17 + $0x58] sm:$0xff] }
  0x17   : > { %261 = vst [vmem:[%s418_s20 + $0x20] sm:$0xff] %v230_v16  ;;  %v235_v33 = vadd.f32 %v204_v27, %v173_v26  ;;  %v176_v34 = vld [vmem:[%s408_s14 + $0x60] sm:$0xff]  ;;  %v236_v36 = vadd.f32 %v205_v30, %v174_v28  ;;  %v177_v37 = vld [vmem:[%s408_s14 + $0x68] sm:$0xff]  ;;  %v237_v39 = vadd.f32 %v206_v32, %v175_v31  ;;  %v178_v40 = vld [vmem:[%s408_s14 + $0x70] sm:$0xff] }
  0x18   : > { %262 = vst [vmem:[%s418_s20 + $0x28] sm:$0xff] %v231_v17  ;;  %v207_v35 = vld [vmem:[%s413_s17 + $0x60] sm:$0xff]  ;;  %v208_v38 = vld [vmem:[%s413_s17 + $0x68] sm:$0xff]  ;;  %v209_v41 = vld [vmem:[%s413_s17 + $0x70] sm:$0xff] }
  0x19   : > { %263 = vst [vmem:[%s418_s20 + $0x30] sm:$0xff] %v232_v21  ;;  %v238_v42 = vadd.f32 %v207_v35, %v176_v34  ;;  %v179_v43 = vld [vmem:[%s408_s14 + $0x78] sm:$0xff]  ;;  %v239_v45 = vadd.f32 %v208_v38, %v177_v37  ;;  %v180_v46 = vld [vmem:[%s408_s14 + $0x80] sm:$0xff]  ;;  %v240_v48 = vadd.f32 %v209_v41, %v178_v40  ;;  %v181_v49 = vld [vmem:[%s408_s14 + $0x88] sm:$0xff] }
  0x1a   : > { %264 = vst [vmem:[%s418_s20 + $0x38] sm:$0xff] %v233_v25  ;;  %v210_v44 = vld [vmem:[%s413_s17 + $0x78] sm:$0xff]  ;;  %v211_v47 = vld [vmem:[%s413_s17 + $0x80] sm:$0xff]  ;;  %v212_v50 = vld [vmem:[%s413_s17 + $0x88] sm:$0xff] }
  0x1b   : > { %265 = vst [vmem:[%s418_s20 + $0x40] sm:$0xff] %v234_v29  ;;  %v241_v51 = vadd.f32 %v210_v44, %v179_v43  ;;  %v182_v52 = vld [vmem:[%s408_s14 + $0x90] sm:$0xff]  ;;  %v242_v54 = vadd.f32 %v211_v47, %v180_v46  ;;  %v183_v55 = vld [vmem:[%s408_s14 + $0x98] sm:$0xff]  ;;  %v243_v57 = vadd.f32 %v212_v50, %v181_v49  ;;  %v184_v58 = vld [vmem:[%s408_s14 + $0xa0] sm:$0xff] }
  0x1c   : > { %266 = vst [vmem:[%s418_s20 + $0x48] sm:$0xff] %v235_v33  ;;  %v213_v53 = vld [vmem:[%s413_s17 + $0x90] sm:$0xff]  ;;  %v214_v56 = vld [vmem:[%s413_s17 + $0x98] sm:$0xff]  ;;  %v215_v59 = vld [vmem:[%s413_s17 + $0xa0] sm:$0xff] }
  0x1d   : > { %267 = vst [vmem:[%s418_s20 + $0x50] sm:$0xff] %v236_v36  ;;  %v244_v60 = vadd.f32 %v213_v53, %v182_v52  ;;  %v185_v61 = vld [vmem:[%s408_s14 + $0xa8] sm:$0xff]  ;;  %v245_v63 = vadd.f32 %v214_v56, %v183_v55  ;;  %v186_v0 = vld [vmem:[%s408_s14 + $0xb0] sm:$0xff]  ;;  %v246_v2 = vadd.f32 %v215_v59, %v184_v58  ;;  %v187_v3 = vld [vmem:[%s408_s14 + $0xb8] sm:$0xff] }
  0x1e   : > { %268 = vst [vmem:[%s418_s20 + $0x58] sm:$0xff] %v237_v39  ;;  %v216_v62 = vld [vmem:[%s413_s17 + $0xa8] sm:$0xff]  ;;  %v217_v1 = vld [vmem:[%s413_s17 + $0xb0] sm:$0xff]  ;;  %v218_v4 = vld [vmem:[%s413_s17 + $0xb8] sm:$0xff] }
  0x1f   : > { %269 = vst [vmem:[%s418_s20 + $0x60] sm:$0xff] %v238_v42  ;;  %v247_v5 = vadd.f32 %v216_v62, %v185_v61  ;;  %v188_v6 = vld [vmem:[%s408_s14 + $0xc0] sm:$0xff]  ;;  %v248_v8 = vadd.f32 %v217_v1, %v186_v0  ;;  %v189_v9 = vld [vmem:[%s408_s14 + $0xc8] sm:$0xff]  ;;  %v249_v11 = vadd.f32 %v218_v4, %v187_v3  ;;  %v190_v12 = vld [vmem:[%s408_s14 + $0xd0] sm:$0xff] }
  0x20   : > { %270 = vst [vmem:[%s418_s20 + $0x68] sm:$0xff] %v239_v45  ;;  %v219_v7 = vld [vmem:[%s413_s17 + $0xc0] sm:$0xff]  ;;  %v220_v10 = vld [vmem:[%s413_s17 + $0xc8] sm:$0xff]  ;;  %v221_v13 = vld [vmem:[%s413_s17 + $0xd0] sm:$0xff] }
  0x21   : > { %271 = vst [vmem:[%s418_s20 + $0x70] sm:$0xff] %v240_v48  ;;  %v250_v14 = vadd.f32 %v219_v7, %v188_v6  ;;  %v191_v15 = vld [vmem:[%s408_s14 + $0xd8] sm:$0xff]  ;;  %v251_v17 = vadd.f32 %v220_v10, %v189_v9  ;;  %v192_v18 = vld [vmem:[%s408_s14 + $0xe0] sm:$0xff]  ;;  %v252_v20 = vadd.f32 %v221_v13, %v190_v12  ;;  %v193_v21 = vld [vmem:[%s408_s14 + $0xe8] sm:$0xff] }
  0x22   : > { %272 = vst [vmem:[%s418_s20 + $0x78] sm:$0xff] %v241_v51  ;;  %v222_v16 = vld [vmem:[%s413_s17 + $0xd8] sm:$0xff]  ;;  %v223_v19 = vld [vmem:[%s413_s17 + $0xe0] sm:$0xff]  ;;  %v224_v22 = vld [vmem:[%s413_s17 + $0xe8] sm:$0xff] }
  0x23   : > { %273 = vst [vmem:[%s418_s20 + $0x80] sm:$0xff] %v242_v54  ;;  %v253_v23 = vadd.f32 %v222_v16, %v191_v15  ;;  %v194_v24 = vld [vmem:[%s408_s14 + $0xf0] sm:$0x1f]  ;;  %v254_v26 = vadd.f32 %v223_v19, %v192_v18  ;;  %v255_v27 = vadd.f32 %v224_v22, %v193_v21 }
  0x24   : > { %274 = vst [vmem:[%s418_s20 + $0x88] sm:$0xff] %v243_v57  ;;  %v225_v25 = vld [vmem:[%s413_s17 + $0xf0] sm:$0x1f] }
  0x25   : > { %275 = vst [vmem:[%s418_s20 + $0x90] sm:$0xff] %v244_v60  ;;  %v256_v28 = vadd.f32 %v225_v25, %v194_v24 }
  0x26   : > { %276 = vst [vmem:[%s418_s20 + $0x98] sm:$0xff] %v245_v63 }
  0x27   : > { %277 = vst [vmem:[%s418_s20 + $0xa0] sm:$0xff] %v246_v2 }
  0x28   : > { %278 = vst [vmem:[%s418_s20 + $0xa8] sm:$0xff] %v247_v5 }
  0x29   : > { %279 = vst [vmem:[%s418_s20 + $0xb0] sm:$0xff] %v248_v8 }
  0x2a   : > { %280 = vst [vmem:[%s418_s20 + $0xb8] sm:$0xff] %v249_v11 }
  0x2b   : > { %281 = vst [vmem:[%s418_s20 + $0xc0] sm:$0xff] %v250_v14 }
  0x2c   : > { %282 = vst [vmem:[%s418_s20 + $0xc8] sm:$0xff] %v251_v17 }
  0x2d   : > { %283 = vst [vmem:[%s418_s20 + $0xd0] sm:$0xff] %v252_v20 }
  0x2e   : > { %284 = vst [vmem:[%s418_s20 + $0xd8] sm:$0xff] %v253_v23 }
  0x2f   : > { %285 = vst [vmem:[%s418_s20 + $0xe0] sm:$0xff] %v254_v26 }
  0x30   : > { %286 = vst [vmem:[%s418_s20 + $0xe8] sm:$0xff] %v255_v27 }
  0x31   : > { %287 = vst [vmem:[%s418_s20 + $0xf0] sm:$0x1f] %v256_v28 }
  0x32 PF: > { %s12_s9 = sadd.s32 1, %s380_s9  }
  0x33   : > { %p9_p4 = scmp.ge.s32.totalorder %s12_s9, 6  }
  0x35   :  { %11 = sbr.rel (!%p9_p4) target bundleno = 1 (0x1), region = 61 }

</bundles_post_ra>
